<compile_context>
chip_gen: v5e
topology: v5e:2x2
jax: 0.10.0
libtpu: 0.0.40
codegen_flags: <defaults>
</compile_context>

<pallas_src>
import jax
import jax.numpy as jnp
import numpy as np
from jax import lax
from jax.experimental import pallas as pl
from jax.experimental.pallas import tpu as pltpu

EMB_DIM = 100
HID_DIM = 256


def _make_rnn_kernel(t_chunk: int, seq_len: int, has_tail: bool, unroll: int):
    """t_chunk: timesteps per grid step; seq_len: true (unpadded) sequence length."""

    def rnn_kernel(xproj_ref, whh_ref, wlin_ref, blin_ref, out_ref, h_scratch):
        c = pl.program_id(1)
        n_c = pl.num_programs(1)

        @pl.when(c == 0)
        def _():
            h_scratch[...] = jnp.zeros_like(h_scratch)

        base = c * t_chunk

        def run_chunk(masked):
            def body(i, h):
                x_t = xproj_ref[i].astype(jnp.float32)          # (bt, 256) bf16 -> f32
                # bf16 x bf16 MXU matmul with f32 accumulation; weight read straight from
                # the VMEM ref (not hoisted into a live Python value -> no vreg pinning).
                pre = x_t + jnp.dot(h.astype(jnp.bfloat16), whh_ref[...],
                                    preferred_element_type=jnp.float32)
                h_new = jnp.tanh(pre)
                if masked:                                       # only on the last chunk
                    h_new = jnp.where(base + i < seq_len, h_new, h)
                return h_new
            return lax.fori_loop(0, t_chunk, body, h_scratch[...], unroll=unroll)

        if has_tail:
            @pl.when(c != n_c - 1)
            def _():
                h_scratch[...] = run_chunk(False)

            @pl.when(c == n_c - 1)
            def _():
                h_scratch[...] = run_chunk(True)
        else:
            h_scratch[...] = run_chunk(False)

        @pl.when(c == n_c - 1)
        def _():
            # N=1 linear as VPU mul + lane reduce (no wasted MXU pass, no lane-padded (256,1)).
            h = h_scratch[...]
            logits = jnp.sum(h * wlin_ref[...], axis=-1, keepdims=True) + blin_ref[0, 0]
            out_ref[...] = logits.astype(out_ref.dtype)

    return rnn_kernel


def predict_importance_pallas(x_proj, w_hh_t_bf16, w_lin_row, b_lin, *,
                              t_chunk=64, batch_tile=256, unroll=8):
    """x_proj: (seq, batch, 256) time-major pre-projected inputs (embed@W_ih + b_ih + b_hh)."""
    seq, batch, hid = x_proj.shape
    assert hid == HID_DIM

    # ---- time tiling ----
    t_chunk = max(1, min(t_chunk, seq))
    n_chunks = pl.cdiv(seq, t_chunk)
    pad_t = n_chunks * t_chunk - seq

    # ---- batch tiling (parallel grid axis; fills v7x's 2nd TensorCore) ----
    if batch <= batch_tile:
        bt, nb, pad_b = batch, 1, 0              # block == full dim, (8,128) rule satisfied
    else:
        assert batch_tile % 8 == 0
        bt = batch_tile
        pad_b = (-batch) % bt
        nb = (batch + pad_b) // bt

    if pad_t or pad_b:
        x_proj = jnp.pad(x_proj, ((0, pad_t), (0, pad_b), (0, 0)))

    unroll_eff = max(1, min(unroll, t_chunk))
    kernel = _make_rnn_kernel(t_chunk, seq, pad_t > 0, unroll_eff)

    out = pl.pallas_call(
        kernel,
        out_shape=jax.ShapeDtypeStruct((batch + pad_b, 1), jnp.float32),
        grid_spec=pltpu.PrefetchScalarGridSpec(
            num_scalar_prefetch=0,
            grid=(nb, n_chunks),
            in_specs=[
                pl.BlockSpec((t_chunk, bt, HID_DIM), lambda b, c: (c, b, 0)),  # x_proj chunk
                pl.BlockSpec((HID_DIM, HID_DIM), lambda b, c: (0, 0)),         # W_hh^T (bf16)
                pl.BlockSpec((1, HID_DIM), lambda b, c: (0, 0)),               # W_lin as row
                pl.BlockSpec(memory_space=pltpu.MemorySpace.SMEM),             # b_lin scalar
            ],
            out_specs=pl.BlockSpec((bt, 1), lambda b, c: (b, 0)),
            scratch_shapes=[pltpu.VMEM((bt, HID_DIM), jnp.float32)],           # f32 h state
        ),
        compiler_params=pltpu.CompilerParams(
            dimension_semantics=("parallel", "arbitrary"),   # batch parallel, time sequential
            vmem_limit_bytes=32 * 1024 * 1024,               # covers v5e's 16 MiB default too
        ),
    )(x_proj, w_hh_t_bf16, w_lin_row, b_lin)

    return out[:batch] if pad_b else out


def prepare_params(params):
    """Precompute (once) the folded input projection E' = embed @ W_ih^T + (b_ih + b_hh)."""
    embed_proj = params["embed"] @ params["w_ih_t"] + params["b"]      # (n_vocab, 256) f32, exact fold
    return dict(
        params,
        embed_proj=embed_proj.astype(jnp.bfloat16),        # bf16 halves gather + kernel-read bytes
        w_hh_t_bf16=params["w_hh_t"].astype(jnp.bfloat16),
    )


def forward(token_ids, prepared, **kw):
    """token_ids: (batch, seq) int32. Returns (batch, 1) logits."""
    # Gather directly in time-major layout (no separate activation transpose in HBM).
    x_proj = prepared["embed_proj"][token_ids.T]           # (seq, batch, 256) bf16
    return predict_importance_pallas(
        x_proj, prepared["w_hh_t_bf16"], prepared["w_lin_row"], prepared["b_lin"], **kw)


def forward_ref(token_ids, params):
    """Pure-JAX f32 reference matching torch RNN semantics."""
    emb = params["embed"][token_ids]               # (batch, seq, 100)
    x_tbc = jnp.transpose(emb, (1, 0, 2))          # (seq, batch, 100)
    batch = token_ids.shape[0]
    h0 = jnp.zeros((batch, HID_DIM), jnp.float32)

    def step(h, x_t):
        h_new = jnp.tanh(x_t @ params["w_ih_t"] + h @ params["w_hh_t"] + params["b"])
        return h_new, None

    h_last, _ = lax.scan(step, h0, x_tbc)
    return h_last @ params["w_lin_row"].T + params["b_lin"]


def init_params(key, n_vocab):
    ks = jax.random.split(key, 6)
    bound = 1.0 / np.sqrt(HID_DIM)
    return {
        "embed":     jax.random.normal(ks[0], (n_vocab, EMB_DIM), jnp.float32),
        "w_ih_t":    jax.random.uniform(ks[1], (EMB_DIM, HID_DIM), jnp.float32, -bound, bound),
        "w_hh_t":    jax.random.uniform(ks[2], (HID_DIM, HID_DIM), jnp.float32, -bound, bound),
        # combined bias b_ih + b_hh, kept as (1, HID_DIM) for broadcast / folding
        "b":         jax.random.uniform(ks[3], (1, HID_DIM), jnp.float32, -bound, bound),
        # Linear weight stored lane-dense as (1, 256)
        "w_lin_row": jax.random.uniform(ks[4], (1, HID_DIM), jnp.float32, -bound, bound),
        "b_lin":     jax.random.uniform(ks[5], (1, 1), jnp.float32, -bound, bound),
    }


if __name__ == "__main__":
    n_vocab = 50
    key = jax.random.PRNGKey(0)
    k_tok1, k_tok2, k_par = jax.random.split(key, 3)

    params = init_params(k_par, n_vocab)
    prepared = prepare_params(params)

    # bf16 weights/activations on the serial chain -> relaxed tolerance vs. the f32 reference.
    RTOL, ATOL = 5e-2, 5e-2

    # Case 1: canonical small shapes (batch=2, seq=8): single time chunk, single batch tile.
    tok1 = jax.random.randint(k_tok1, (2, 8), 0, n_vocab, dtype=jnp.int32)
    out1 = jax.block_until_ready(forward(tok1, prepared))
    ref1 = jax.block_until_ready(forward_ref(tok1, params))
    np.testing.assert_allclose(np.asarray(out1), np.asarray(ref1), rtol=RTOL, atol=ATOL)
    assert out1.shape == (2, 1)

    # Case 2: exercises multi-chunk recurrence, the masked time tail, and batch tiling/padding.
    tok2 = jax.random.randint(k_tok2, (10, 13), 0, n_vocab, dtype=jnp.int32)
    out2 = jax.block_until_ready(forward(tok2, prepared, t_chunk=4, batch_tile=8, unroll=4))
    ref2 = jax.block_until_ready(forward_ref(tok2, params))
    np.testing.assert_allclose(np.asarray(out2), np.asarray(ref2), rtol=RTOL, atol=ATOL)
    assert out2.shape == (10, 1)

    print("KERNEL_OK")
</pallas_src>

<mosaic_0001>
module attributes {stable_mosaic.version = 11 : i64} {
  func.func @rnn_kernel(%arg0: i32, %arg1: i32, %arg2: memref<8x2x256xbf16, #tpu.memory_space<vmem>>, %arg3: memref<256x256xbf16, #tpu.memory_space<vmem>>, %arg4: memref<1x256xf32, #tpu.memory_space<vmem>>, %arg5: memref<1x1xf32, #tpu.memory_space<smem>>, %arg6: memref<2x1xf32, #tpu.memory_space<vmem>>, %arg7: memref<2x256xf32, #tpu.memory_space<vmem>>) attributes {dimension_semantics = [#tpu.dimension_semantics<parallel>, #tpu.dimension_semantics<arbitrary>], iteration_bounds = array<i64: 1, 1>, scalar_prefetch = 0 : i64, scratch_operands = 1 : i64, tpu.core_type = #tpu.core_type<tc>, window_params = [{transform_indices = @transform_0, window_bounds = array<i64: 8, 2, 256>}, {pipeline_mode = #tpu.pipeline_mode<synchronous>, transform_indices = @transform_1, window_bounds = array<i64: 256, 256>}, {pipeline_mode = #tpu.pipeline_mode<synchronous>, transform_indices = @transform_2, window_bounds = array<i64: 1, 256>}, {transform_indices = @transform_3, window_bounds = array<i64: 1, 1>}, {transform_indices = @transform_4, window_bounds = array<i64: 2, 1>}]} {
    %c0_i32 = arith.constant 0 : i32
    %0 = arith.cmpi eq, %arg1, %c0_i32 : i32
    %1 = arith.extui %0 : i1 to i32
    %c0_i32_0 = arith.constant 0 : i32
    %2 = arith.cmpi ne, %1, %c0_i32_0 : i32
    scf.if %2 {
      %cst_46 = arith.constant 0.000000e+00 : f32
      %80 = vector.broadcast %cst_46 : f32 to vector<2x256xf32>
      %c0_47 = arith.constant 0 : index
      %c0_48 = arith.constant 0 : index
      %81 = vector.load %arg7[%c0_47, %c0_48] : memref<2x256xf32, #tpu.memory_space<vmem>>, vector<2x256xf32>
      tpu.vector_store %arg7[%c0_47, %c0_48], %80 {strides = array<i32>} : memref<2x256xf32, #tpu.memory_space<vmem>>, vector<2x256xf32>,
    } else {
    }
    %c0 = arith.constant 0 : index
    %c0_1 = arith.constant 0 : index
    %3 = vector.load %arg7[%c0, %c0_1] : memref<2x256xf32, #tpu.memory_space<vmem>>, vector<2x256xf32>
    %c0_i32_2 = arith.constant 0 : i32
    %4 = arith.index_cast %c0_i32_2 : i32 to index
    %c0_3 = arith.constant 0 : index
    %c0_4 = arith.constant 0 : index
    %5 = vector.load %arg2[%4, %c0_3, %c0_4] : memref<8x2x256xbf16, #tpu.memory_space<vmem>>, vector<1x2x256xbf16>
    %6 = vector.shape_cast %5 : vector<1x2x256xbf16> to vector<2x256xbf16>
    %7 = arith.extf %6 : vector<2x256xbf16> to vector<2x256xf32>
    %8 = arith.truncf %3 : vector<2x256xf32> to vector<2x256xbf16>
    %c0_5 = arith.constant 0 : index
    %c0_6 = arith.constant 0 : index
    %9 = vector.load %arg3[%c0_5, %c0_6] : memref<256x256xbf16, #tpu.memory_space<vmem>>, vector<256x256xbf16>
    %cst = arith.constant dense<0.000000e+00> : vector<2x256xf32>
    %10 = tpu.matmul %8, %9, %cst {dimension_numbers = #tpu.dot_dimension_numbers<[1], [0], [0], [1], [0, 0, 1, 1], [], []>} : vector<2x256xbf16>, vector<256x256xbf16>, vector<2x256xf32> -> vector<2x256xf32>
    %11 = arith.addf %7, %10 : vector<2x256xf32>
    %12 = math.tanh %11 : vector<2x256xf32>
    %c1_i32 = arith.constant 1 : i32
    %13 = arith.index_cast %c1_i32 : i32 to index
    %c0_7 = arith.constant 0 : index
    %c0_8 = arith.constant 0 : index
    %14 = vector.load %arg2[%13, %c0_7, %c0_8] : memref<8x2x256xbf16, #tpu.memory_space<vmem>>, vector<1x2x256xbf16>
    %15 = vector.shape_cast %14 : vector<1x2x256xbf16> to vector<2x256xbf16>
    %16 = arith.extf %15 : vector<2x256xbf16> to vector<2x256xf32>
    %17 = arith.truncf %12 : vector<2x256xf32> to vector<2x256xbf16>
    %c0_9 = arith.constant 0 : index
    %c0_10 = arith.constant 0 : index
    %18 = vector.load %arg3[%c0_9, %c0_10] : memref<256x256xbf16, #tpu.memory_space<vmem>>, vector<256x256xbf16>
    %cst_11 = arith.constant dense<0.000000e+00> : vector<2x256xf32>
    %19 = tpu.matmul %17, %18, %cst_11 {dimension_numbers = #tpu.dot_dimension_numbers<[1], [0], [0], [1], [0, 0, 1, 1], [], []>} : vector<2x256xbf16>, vector<256x256xbf16>, vector<2x256xf32> -> vector<2x256xf32>
    %20 = arith.addf %16, %19 : vector<2x256xf32>
    %21 = math.tanh %20 : vector<2x256xf32>
    %c2_i32 = arith.constant 2 : i32
    %22 = arith.index_cast %c2_i32 : i32 to index
    %c0_12 = arith.constant 0 : index
    %c0_13 = arith.constant 0 : index
    %23 = vector.load %arg2[%22, %c0_12, %c0_13] : memref<8x2x256xbf16, #tpu.memory_space<vmem>>, vector<1x2x256xbf16>
    %24 = vector.shape_cast %23 : vector<1x2x256xbf16> to vector<2x256xbf16>
    %25 = arith.extf %24 : vector<2x256xbf16> to vector<2x256xf32>
    %26 = arith.truncf %21 : vector<2x256xf32> to vector<2x256xbf16>
    %c0_14 = arith.constant 0 : index
    %c0_15 = arith.constant 0 : index
    %27 = vector.load %arg3[%c0_14, %c0_15] : memref<256x256xbf16, #tpu.memory_space<vmem>>, vector<256x256xbf16>
    %cst_16 = arith.constant dense<0.000000e+00> : vector<2x256xf32>
    %28 = tpu.matmul %26, %27, %cst_16 {dimension_numbers = #tpu.dot_dimension_numbers<[1], [0], [0], [1], [0, 0, 1, 1], [], []>} : vector<2x256xbf16>, vector<256x256xbf16>, vector<2x256xf32> -> vector<2x256xf32>
    %29 = arith.addf %25, %28 : vector<2x256xf32>
    %30 = math.tanh %29 : vector<2x256xf32>
    %c3_i32 = arith.constant 3 : i32
    %31 = arith.index_cast %c3_i32 : i32 to index
    %c0_17 = arith.constant 0 : index
    %c0_18 = arith.constant 0 : index
    %32 = vector.load %arg2[%31, %c0_17, %c0_18] : memref<8x2x256xbf16, #tpu.memory_space<vmem>>, vector<1x2x256xbf16>
    %33 = vector.shape_cast %32 : vector<1x2x256xbf16> to vector<2x256xbf16>
    %34 = arith.extf %33 : vector<2x256xbf16> to vector<2x256xf32>
    %35 = arith.truncf %30 : vector<2x256xf32> to vector<2x256xbf16>
    %c0_19 = arith.constant 0 : index
    %c0_20 = arith.constant 0 : index
    %36 = vector.load %arg3[%c0_19, %c0_20] : memref<256x256xbf16, #tpu.memory_space<vmem>>, vector<256x256xbf16>
    %cst_21 = arith.constant dense<0.000000e+00> : vector<2x256xf32>
    %37 = tpu.matmul %35, %36, %cst_21 {dimension_numbers = #tpu.dot_dimension_numbers<[1], [0], [0], [1], [0, 0, 1, 1], [], []>} : vector<2x256xbf16>, vector<256x256xbf16>, vector<2x256xf32> -> vector<2x256xf32>
    %38 = arith.addf %34, %37 : vector<2x256xf32>
    %39 = math.tanh %38 : vector<2x256xf32>
    %c4_i32 = arith.constant 4 : i32
    %40 = arith.index_cast %c4_i32 : i32 to index
    %c0_22 = arith.constant 0 : index
    %c0_23 = arith.constant 0 : index
    %41 = vector.load %arg2[%40, %c0_22, %c0_23] : memref<8x2x256xbf16, #tpu.memory_space<vmem>>, vector<1x2x256xbf16>
    %42 = vector.shape_cast %41 : vector<1x2x256xbf16> to vector<2x256xbf16>
    %43 = arith.extf %42 : vector<2x256xbf16> to vector<2x256xf32>
    %44 = arith.truncf %39 : vector<2x256xf32> to vector<2x256xbf16>
    %c0_24 = arith.constant 0 : index
    %c0_25 = arith.constant 0 : index
    %45 = vector.load %arg3[%c0_24, %c0_25] : memref<256x256xbf16, #tpu.memory_space<vmem>>, vector<256x256xbf16>
    %cst_26 = arith.constant dense<0.000000e+00> : vector<2x256xf32>
    %46 = tpu.matmul %44, %45, %cst_26 {dimension_numbers = #tpu.dot_dimension_numbers<[1], [0], [0], [1], [0, 0, 1, 1], [], []>} : vector<2x256xbf16>, vector<256x256xbf16>, vector<2x256xf32> -> vector<2x256xf32>
    %47 = arith.addf %43, %46 : vector<2x256xf32>
    %48 = math.tanh %47 : vector<2x256xf32>
    %c5_i32 = arith.constant 5 : i32
    %49 = arith.index_cast %c5_i32 : i32 to index
    %c0_27 = arith.constant 0 : index
    %c0_28 = arith.constant 0 : index
    %50 = vector.load %arg2[%49, %c0_27, %c0_28] : memref<8x2x256xbf16, #tpu.memory_space<vmem>>, vector<1x2x256xbf16>
    %51 = vector.shape_cast %50 : vector<1x2x256xbf16> to vector<2x256xbf16>
    %52 = arith.extf %51 : vector<2x256xbf16> to vector<2x256xf32>
    %53 = arith.truncf %48 : vector<2x256xf32> to vector<2x256xbf16>
    %c0_29 = arith.constant 0 : index
    %c0_30 = arith.constant 0 : index
    %54 = vector.load %arg3[%c0_29, %c0_30] : memref<256x256xbf16, #tpu.memory_space<vmem>>, vector<256x256xbf16>
    %cst_31 = arith.constant dense<0.000000e+00> : vector<2x256xf32>
    %55 = tpu.matmul %53, %54, %cst_31 {dimension_numbers = #tpu.dot_dimension_numbers<[1], [0], [0], [1], [0, 0, 1, 1], [], []>} : vector<2x256xbf16>, vector<256x256xbf16>, vector<2x256xf32> -> vector<2x256xf32>
    %56 = arith.addf %52, %55 : vector<2x256xf32>
    %57 = math.tanh %56 : vector<2x256xf32>
    %c6_i32 = arith.constant 6 : i32
    %58 = arith.index_cast %c6_i32 : i32 to index
    %c0_32 = arith.constant 0 : index
    %c0_33 = arith.constant 0 : index
    %59 = vector.load %arg2[%58, %c0_32, %c0_33] : memref<8x2x256xbf16, #tpu.memory_space<vmem>>, vector<1x2x256xbf16>
    %60 = vector.shape_cast %59 : vector<1x2x256xbf16> to vector<2x256xbf16>
    %61 = arith.extf %60 : vector<2x256xbf16> to vector<2x256xf32>
    %62 = arith.truncf %57 : vector<2x256xf32> to vector<2x256xbf16>
    %c0_34 = arith.constant 0 : index
    %c0_35 = arith.constant 0 : index
    %63 = vector.load %arg3[%c0_34, %c0_35] : memref<256x256xbf16, #tpu.memory_space<vmem>>, vector<256x256xbf16>
    %cst_36 = arith.constant dense<0.000000e+00> : vector<2x256xf32>
    %64 = tpu.matmul %62, %63, %cst_36 {dimension_numbers = #tpu.dot_dimension_numbers<[1], [0], [0], [1], [0, 0, 1, 1], [], []>} : vector<2x256xbf16>, vector<256x256xbf16>, vector<2x256xf32> -> vector<2x256xf32>
    %65 = arith.addf %61, %64 : vector<2x256xf32>
    %66 = math.tanh %65 : vector<2x256xf32>
    %c7_i32 = arith.constant 7 : i32
    %67 = arith.index_cast %c7_i32 : i32 to index
    %c0_37 = arith.constant 0 : index
    %c0_38 = arith.constant 0 : index
    %68 = vector.load %arg2[%67, %c0_37, %c0_38] : memref<8x2x256xbf16, #tpu.memory_space<vmem>>, vector<1x2x256xbf16>
    %69 = vector.shape_cast %68 : vector<1x2x256xbf16> to vector<2x256xbf16>
    %70 = arith.extf %69 : vector<2x256xbf16> to vector<2x256xf32>
    %71 = arith.truncf %66 : vector<2x256xf32> to vector<2x256xbf16>
    %c0_39 = arith.constant 0 : index
    %c0_40 = arith.constant 0 : index
    %72 = vector.load %arg3[%c0_39, %c0_40] : memref<256x256xbf16, #tpu.memory_space<vmem>>, vector<256x256xbf16>
    %cst_41 = arith.constant dense<0.000000e+00> : vector<2x256xf32>
    %73 = tpu.matmul %71, %72, %cst_41 {dimension_numbers = #tpu.dot_dimension_numbers<[1], [0], [0], [1], [0, 0, 1, 1], [], []>} : vector<2x256xbf16>, vector<256x256xbf16>, vector<2x256xf32> -> vector<2x256xf32>
    %74 = arith.addf %70, %73 : vector<2x256xf32>
    %75 = math.tanh %74 : vector<2x256xf32>
    %c8_i32 = arith.constant 8 : i32
    %c0_42 = arith.constant 0 : index
    %c0_43 = arith.constant 0 : index
    %76 = vector.load %arg7[%c0_42, %c0_43] : memref<2x256xf32, #tpu.memory_space<vmem>>, vector<2x256xf32>
    tpu.vector_store %arg7[%c0_42, %c0_43], %75 {strides = array<i32>} : memref<2x256xf32, #tpu.memory_space<vmem>>, vector<2x256xf32>,
    %c0_i32_44 = arith.constant 0 : i32
    %77 = arith.cmpi eq, %arg1, %c0_i32_44 : i32
    %78 = arith.extui %77 : i1 to i32
    %c0_i32_45 = arith.constant 0 : i32
    %79 = arith.cmpi ne, %78, %c0_i32_45 : i32
    scf.if %79 {
      %c0_46 = arith.constant 0 : index
      %c0_47 = arith.constant 0 : index
      %80 = vector.load %arg7[%c0_46, %c0_47] : memref<2x256xf32, #tpu.memory_space<vmem>>, vector<2x256xf32>
      %c0_48 = arith.constant 0 : index
      %c0_49 = arith.constant 0 : index
      %81 = vector.load %arg4[%c0_48, %c0_49] : memref<1x256xf32, #tpu.memory_space<vmem>>, vector<1x256xf32>
      %82 = vector.broadcast %81 : vector<1x256xf32> to vector<2x256xf32>
      %83 = arith.mulf %80, %82 : vector<2x256xf32>
      %cst_50 = arith.constant dense<0.000000e+00> : vector<2xf32>
      %84 = vector.multi_reduction <add>, %83, %cst_50 [1] : vector<2x256xf32> to vector<2xf32>
      %85 = vector.shape_cast %84 : vector<2xf32> to vector<2x1xf32>
      %c0_51 = arith.constant 0 : index
      %c0_52 = arith.constant 0 : index
      %86 = memref.load %arg5[%c0_51, %c0_52] : memref<1x1xf32, #tpu.memory_space<smem>>
      %87 = vector.broadcast %86 : f32 to vector<2x1xf32>
      %88 = arith.addf %85, %87 : vector<2x1xf32>
      %c0_53 = arith.constant 0 : index
      %c0_54 = arith.constant 0 : index
      %89 = vector.load %arg6[%c0_53, %c0_54] : memref<2x1xf32, #tpu.memory_space<vmem>>, vector<2x1xf32>
      tpu.vector_store %arg6[%c0_53, %c0_54], %88 {strides = array<i32>} : memref<2x1xf32, #tpu.memory_space<vmem>>, vector<2x1xf32>,
    } else {
    }
    return
  }
  func.func @transform_0(%arg0: i32, %arg1: i32) -> (i32, i32, i32) {
    %c0_i32 = arith.constant 0 : i32
    %c0_i32_0 = arith.constant 0 : i32
    return %arg1, %arg0, %c0_i32 : i32, i32, i32
  }
  func.func @transform_1(%arg0: i32, %arg1: i32) -> (i32, i32) {
    %c0_i32 = arith.constant 0 : i32
    %c0_i32_0 = arith.constant 0 : i32
    %c0_i32_1 = arith.constant 0 : i32
    return %c0_i32, %c0_i32_0 : i32, i32
  }
  func.func @transform_2(%arg0: i32, %arg1: i32) -> (i32, i32) {
    %c0_i32 = arith.constant 0 : i32
    %c0_i32_0 = arith.constant 0 : i32
    %c0_i32_1 = arith.constant 0 : i32
    return %c0_i32, %c0_i32_0 : i32, i32
  }
  func.func @transform_3(%arg0: i32, %arg1: i32) -> (i32, i32) {
    %c0_i32 = arith.constant 0 : i32
    %c0_i32_0 = arith.constant 0 : i32
    %c0_i32_1 = arith.constant 0 : i32
    return %c0_i32, %c0_i32_0 : i32, i32
  }
  func.func @transform_4(%arg0: i32, %arg1: i32) -> (i32, i32) {
    %c0_i32 = arith.constant 0 : i32
    %c0_i32_0 = arith.constant 0 : i32
    return %arg0, %c0_i32 : i32, i32
  }
}

</mosaic_0001>

<bundles_post_ra>
// kernel: tpu_custom_call.1
= control target key start
LH: loop header
LB: loop body
LE: loop exit
PB: predicated region body
PF: predicated region fallthrough
CT: control target
= control target key end

     0   :  { %10 = vsyncpa [#allocation5], 0  ;;  %s1456_s0 = inlined_call_operand.hbm [shape: bf16[8,2,256], index: 0, kind: input, shape index: {}]   ;;  %s1457_s1 = inlined_call_operand.hbm [shape: bf16[256,256], index: 1, kind: input, shape index: {}]   ;;  %s1458_s2 = inlined_call_operand.vmem [shape: f32[1,256], index: 2, kind: input, shape index: {}]   ;;  %s1459_s3 = inlined_call_operand.<no memory space> [shape: f32[1,1], index: 3, kind: input, shape index: {}]   ;;  %s1460_s4 = inlined_call_operand.vmem [shape: f32[2,1], index: 4, kind: output, shape index: {}]  }
   0x1   :  { %s16_s17 = sshll.u32 %s1456_s0, 4  ;;  %s17_s17 = int_to_ptr.hbm [resolvable:$true] %s16_s17 }
   0x2   :  { %11 = vsyncpa [#allocation7], 0  ;;  %s1078_s18 = smov [#allocation4]   ;;  %s29_s22 = sshll.u32 %s1457_s1, 4  ;;  %s30_s22 = int_to_ptr.hbm [resolvable:$true] %s29_s22 }
   0x3   :  { %s18_s19 = sshll.u32 %s1078_s18, 4  ;;  %s1079_s23 = smov 32   ;;  %s19_s19 = int_to_ptr.vmem [resolvable:$true] %s18_s19 }
   0x4   :  { %s1080_s24 = smov 2   ;;  %s1081_s25 = smov [#allocation6]  }
   0x5   :  { %24 = dma.hbm_to_vmem [thread:$0]  %s17_s17, 256, %s19_s19, [#allocation5], %s1079_s23, %s1079_s23, %s1080_s24  }
   0x6   :  { %s31_s26 = sshll.u32 %s1081_s25, 4  ;;  %s1082_s27 = smov 128   ;;  %s32_s26 = int_to_ptr.vmem [resolvable:$true] %s31_s26 }
   0x7   :  { %s1083_s28 = smov 8  }
   0x8   :  { %37 = dma.hbm_to_vmem [thread:$0]  %s30_s22, 4096, %s32_s26, [#allocation7], %s1082_s27, %s1082_s27, %s1083_s28  }
   0x9   :  { %1074 = dma.done.wait [#allocation5], 256  }
   0xa   :  { %1075 = vsyncadd [#allocation5], 4294967040 }
   0xb   :  { %1076 = dma.done.wait [#allocation7], 4096  }
   0xc   :  { %1077 = vsyncadd [#allocation7], 4294963200  ;;  %v1084_v0 = vmov 0.0   ;;  %v901_v1 = vld [vmem:[#allocation6 + $0x70] sm:$0xf]  ;;  %vm313_vm0 = vcmask 1041408  }
   0xd   :  { %54 = vst [vmem:[#allocation2] sm:$0xf] %v1084_v0  ;;  %v986_v2 = vld [vmem:[#allocation6 + $0x74] sm:$0xf0]  ;;  %v965_v3 = vld [vmem:[#allocation6 + $0xf0] sm:$0xf] }
   0xe   :  { %v1116_v4 = vor.u32 %v986_v2, %v901_v1  ;;  %v1002_v5 = vld [vmem:[#allocation6 + $0xf4] sm:$0xf0]  ;;  %v985_v6 = vld [vmem:[#allocation6 + $0x74] sm:$0xf]  ;;  %v903_v7 = vld [vmem:[#allocation6 + $0x78] sm:$0xf0] }
   0xf   :  { %v1118_v8 = vor.u32 %v1002_v5, %v965_v3  ;;  %v1120_v9 = vor.u32 %v985_v6, %v903_v7  ;;  %v1001_v10 = vld [vmem:[#allocation6 + $0xf4] sm:$0xf]  ;;  %v967_v11 = vld [vmem:[#allocation6 + $0xf8] sm:$0xf0]  ;;  %v893_v12 = vld [vmem:[#allocation6 + $0x60] sm:$0xf] }
  0x10   :  { %258 = vmatpush.bf16.msra.mxu0 %v1116_v4  ;;  %v1123_v13 = vor.u32 %v1001_v10, %v967_v11  ;;  %v984_v14 = vld [vmem:[#allocation6 + $0x64] sm:$0xf0]  ;;  %v957_v15 = vld [vmem:[#allocation6 + $0xe0] sm:$0xf]  ;;  %v983_v19 = vld [vmem:[#allocation6 + $0x64] sm:$0xf] }
  0x11   :  { %v1000_v16 = vld [vmem:[#allocation6 + $0xe4] sm:$0xf0]  ;;  %271 = vmatpush.bf16.msra.mxu1 %v1118_v8  ;;  %284 = vmatpush.bf16.msra.mxu2 %v1120_v9  ;;  %v1127_v17 = vor.u32 %v984_v14, %v893_v12  ;;  %v895_v20 = vld [vmem:[#allocation6 + $0x68] sm:$0xf0]  ;;  %v999_v21 = vld [vmem:[#allocation6 + $0xe4] sm:$0xf] }
  0x12   :  { %v1129_v18 = vor.u32 %v1000_v16, %v957_v15  ;;  %297 = vmatpush.bf16.msra.mxu3 %v1123_v13  ;;  %v1132_v22 = vor.u32 %v983_v19, %v895_v20  ;;  %v959_v23 = vld [vmem:[#allocation6 + $0xe8] sm:$0xf0]  ;;  %v885_v24 = vld [vmem:[#allocation6 + $0x50] sm:$0xf]  ;;  %v982_v25 = vld [vmem:[#allocation6 + $0x54] sm:$0xf0] }
  0x13   :  { %v1134_v26 = vor.u32 %v999_v21, %v959_v23  ;;  %v949_v27 = vld [vmem:[#allocation6 + $0xd0] sm:$0xf]  ;;  %v998_v28 = vld [vmem:[#allocation6 + $0xd4] sm:$0xf0]  ;;  %v981_v29 = vld [vmem:[#allocation6 + $0x54] sm:$0xf]  ;;  %v1137_v30 = vor.u32 %v982_v25, %v885_v24 }
  0x14   :  { %259 = vmatpush.bf16.msra.mxu0 %v1127_v17  ;;  %v887_v31 = vld [vmem:[#allocation6 + $0x58] sm:$0xf0]  ;;  %v997_v32 = vld [vmem:[#allocation6 + $0xd4] sm:$0xf]  ;;  %v1141_v34 = vor.u32 %v998_v28, %v949_v27  ;;  %v877_v36 = vld [vmem:[#allocation6 + $0x40] sm:$0xf] }
  0x15   :  { %v951_v33 = vld [vmem:[#allocation6 + $0xd8] sm:$0xf0]  ;;  %272 = vmatpush.bf16.msra.mxu1 %v1129_v18  ;;  %285 = vmatpush.bf16.msra.mxu2 %v1132_v22  ;;  %v1143_v35 = vor.u32 %v981_v29, %v887_v31  ;;  %v980_v37 = vld [vmem:[#allocation6 + $0x44] sm:$0xf0]  ;;  %v941_v38 = vld [vmem:[#allocation6 + $0xc0] sm:$0xf] }
  0x16   :  { %298 = vmatpush.bf16.msra.mxu3 %v1134_v26  ;;  %v1146_v39 = vor.u32 %v997_v32, %v951_v33  ;;  %v996_v40 = vld [vmem:[#allocation6 + $0xc4] sm:$0xf0]  ;;  %v979_v41 = vld [vmem:[#allocation6 + $0x44] sm:$0xf]  ;;  %v879_v42 = vld [vmem:[#allocation6 + $0x48] sm:$0xf0]  ;;  %v1149_v45 = vor.u32 %v980_v37, %v877_v36 }
  0x17   :  { %v995_v43 = vld [vmem:[#allocation6 + $0xc4] sm:$0xf]  ;;  %v943_v44 = vld [vmem:[#allocation6 + $0xc8] sm:$0xf0]  ;;  %v1153_v46 = vor.u32 %v996_v40, %v941_v38  ;;  %v1155_v47 = vor.u32 %v979_v41, %v879_v42  ;;  %v869_v48 = vld [vmem:[#allocation6 + $0x30] sm:$0xf] }
  0x18   :  { %260 = vmatpush.bf16.msra.mxu0 %v1137_v30  ;;  %v978_v49 = vld [vmem:[#allocation6 + $0x34] sm:$0xf0]  ;;  %v933_v50 = vld [vmem:[#allocation6 + $0xb0] sm:$0xf]  ;;  %v1158_v51 = vor.u32 %v995_v43, %v943_v44  ;;  %v977_v53 = vld [vmem:[#allocation6 + $0x34] sm:$0xf] }
  0x19   :  { %273 = vmatpush.bf16.msra.mxu1 %v1141_v34  ;;  %286 = vmatpush.bf16.msra.mxu2 %v1143_v35  ;;  %v994_v52 = vld [vmem:[#allocation6 + $0xb4] sm:$0xf0]  ;;  %v871_v54 = vld [vmem:[#allocation6 + $0x38] sm:$0xf0]  ;;  %v993_v55 = vld [vmem:[#allocation6 + $0xb4] sm:$0xf]  ;;  %v1161_v57 = vor.u32 %v978_v49, %v869_v48 }
  0x1a   :  { %299 = vmatpush.bf16.msra.mxu3 %v1146_v39  ;;  %v935_v56 = vld [vmem:[#allocation6 + $0xb8] sm:$0xf0]  ;;  %v1165_v58 = vor.u32 %v994_v52, %v933_v50  ;;  %v1167_v59 = vor.u32 %v977_v53, %v871_v54  ;;  %v861_v60 = vld [vmem:[#allocation6 + $0x20] sm:$0xf]  ;;  %v976_v61 = vld [vmem:[#allocation6 + $0x24] sm:$0xf0] }
  0x1b   :  { %v925_v62 = vld [vmem:[#allocation6 + $0xa0] sm:$0xf]  ;;  %v1170_v63 = vor.u32 %v993_v55, %v935_v56  ;;  %v992_v0 = vld [vmem:[#allocation6 + $0xa4] sm:$0xf0]  ;;  %v975_v1 = vld [vmem:[#allocation6 + $0x24] sm:$0xf]  ;;  %v1173_v6 = vor.u32 %v976_v61, %v861_v60 }
  0x1c   :  { %261 = vmatpush.bf16.msra.mxu0 %v1149_v45  ;;  %v863_v2 = vld [vmem:[#allocation6 + $0x28] sm:$0xf0]  ;;  %v991_v3 = vld [vmem:[#allocation6 + $0xa4] sm:$0xf]  ;;  %v853_v7 = vld [vmem:[#allocation6 + $0x10] sm:$0xf]  ;;  %v1177_v10 = vor.u32 %v992_v0, %v925_v62 }
  0x1d   :  { %274 = vmatpush.bf16.msra.mxu1 %v1153_v46  ;;  %287 = vmatpush.bf16.msra.mxu2 %v1155_v47  ;;  %v927_v5 = vld [vmem:[#allocation6 + $0xa8] sm:$0xf0]  ;;  %v1179_v11 = vor.u32 %v975_v1, %v863_v2  ;;  %v974_v12 = vld [vmem:[#allocation6 + $0x14] sm:$0xf0]  ;;  %v917_v14 = vld [vmem:[#allocation6 + $0x90] sm:$0xf] }
  0x1e   :  { %300 = vmatpush.bf16.msra.mxu3 %v1158_v51  ;;  %v990_v15 = vld [vmem:[#allocation6 + $0x94] sm:$0xf0]  ;;  %v1182_v16 = vor.u32 %v991_v3, %v927_v5  ;;  %v973_v19 = vld [vmem:[#allocation6 + $0x14] sm:$0xf]  ;;  %v855_v20 = vld [vmem:[#allocation6 + $0x18] sm:$0xf0]  ;;  %v1185_v25 = vor.u32 %v974_v12, %v853_v7 }
  0x1f   :  { %v55_v21 = vld [vmem:[#allocation2] sm:$0xf]  ;;  %v989_v23 = vld [vmem:[#allocation6 + $0x94] sm:$0xf]  ;;  %v919_v24 = vld [vmem:[#allocation6 + $0x98] sm:$0xf0]  ;;  %v1189_v27 = vor.u32 %v990_v15, %v917_v14  ;;  %v1191_v28 = vor.u32 %v973_v19, %v855_v20 }
  0x20   :  { %262 = vmatpush.bf16.msra.mxu0 %v1161_v57  ;;  %59 = vst [vmem:[#allocation1] ss:$4 sm:$0xff] %v55_v21  ;;  %v845_v29 = vld [vmem:[#allocation6] sm:$0xf]  ;;  %v972_v31 = vld [vmem:[#allocation6 + $0x4] sm:$0xf0]  ;;  %v1194_v33 = vor.u32 %v989_v23, %v919_v24 }
  0x21   :  { %275 = vmatpush.bf16.msra.mxu1 %v1165_v58  ;;  %288 = vmatpush.bf16.msra.mxu2 %v1167_v59  ;;  %v909_v32 = vld [vmem:[#allocation6 + $0x80] sm:$0xf]  ;;  %v988_v36 = vld [vmem:[#allocation6 + $0x84] sm:$0xf0]  ;;  %v971_v37 = vld [vmem:[#allocation6 + $0x4] sm:$0xf]  ;;  %v1197_v42 = vor.u32 %v972_v31, %v845_v29 }
  0x22   :  { %301 = vmatpush.bf16.msra.mxu3 %v1170_v63  ;;  %v847_v38 = vld [vmem:[#allocation6 + $0x8] sm:$0xf0]  ;;  %v987_v40 = vld [vmem:[#allocation6 + $0x84] sm:$0xf]  ;;  %v1201_v43 = vor.u32 %v988_v36, %v909_v32  ;;  %v56_v60 = vld [vmem:[#allocation4] sm:$0x3] }
  0x23   :  { %v911_v41 = vld [vmem:[#allocation6 + $0x88] sm:$0xf0]  ;;  %v1203_v44 = vor.u32 %v971_v37, %v847_v38  ;;  %v57_v3 = vunpack.c.l.bf16 %v56_v60  ;;  %v319_v32 = vld [vmem:[#allocation4 + $0x2] sm:$0x3]  ;;  %vm835_vm1 = vcmask 1024  }
  0x24   :  { %263 = vmatpush.bf16.msra.mxu0 %v1173_v6  ;;  %v1206_v48 = vor.u32 %v987_v40, %v911_v41 }
  0x25   :  { %276 = vmatpush.bf16.msra.mxu1 %v1177_v10  ;;  %289 = vmatpush.bf16.msra.mxu2 %v1179_v11 }
  0x26   :  { %302 = vmatpush.bf16.msra.mxu3 %v1182_v16 }
  0x27   :  { %v60_v49 = vld.sshfl [vmem:[#allocation1] sm:$0xff pattern:$0x73625140]  ;;  %v61_v50 = vld.sshfl [vmem:[#allocation1 + $0x8] sm:$0xff pattern:$0x73625140] }
  0x28   :  { %264 = vmatpush.bf16.msra.mxu0 %v1185_v25  ;;  %v64_v52 = vpack.c.bf16 %v60_v49, %v60_v49  ;;  %v65_v53 = vpack.c.bf16 %v61_v50, %v61_v50  ;;  %v320_v49 = vunpack.c.l.bf16 %v319_v32 }
  0x29   :  { %277 = vmatpush.bf16.msra.mxu1 %v1189_v27  ;;  %290 = vmatpush.bf16.msra.mxu2 %v1191_v28 }
  0x2a   :  { %303 = vmatpush.bf16.msra.mxu3 %v1194_v33 }
  0x2c   :  { %265 = vmatpush.bf16.msra.mxu0 %v1197_v42 }
  0x2d   :  { %278 = vmatpush.bf16.msra.mxu1 %v1201_v43  ;;  %291 = vmatpush.bf16.msra.mxu2 %v1203_v44 }
  0x2e   :  { %304 = vmatpush.bf16.msra.mxu3 %v1206_v48 }
  0x2f   :  { %266 = vmatmul.bf16.vlgmr.msra.gmra.mxu0 %v64_v52 }
  0x30   :  { %329 = vmatpush.bf16.msrb.mxu0 %v1116_v4  ;;  %279 = vmatmul.bf16.vlgmr.msra.gmra.mxu1 %v65_v53 }
  0x31   :  { %342 = vmatpush.bf16.msrb.mxu1 %v1118_v8  ;;  %292 = vmatmul.bf16.vlgmr.msra.gmra.mxu2 %v64_v52 }
  0x32   :  { %305 = vmatmul.bf16.vlgmr.msra.gmra.mxu3 %v65_v53  ;;  %355 = vmatpush.bf16.msrb.mxu2 %v1120_v9 }
  0x33   :  { %368 = vmatpush.bf16.msrb.mxu3 %v1123_v13 }
  0x34   :  { %330 = vmatpush.bf16.msrb.mxu0 %v1127_v17 }
  0x35   :  { %343 = vmatpush.bf16.msrb.mxu1 %v1129_v18 }
  0x36   :  { %356 = vmatpush.bf16.msrb.mxu2 %v1132_v22 }
  0x37   :  { %369 = vmatpush.bf16.msrb.mxu3 %v1134_v26 }
  0x38   :  { %331 = vmatpush.bf16.msrb.mxu0 %v1137_v30 }
  0x39   :  { %344 = vmatpush.bf16.msrb.mxu1 %v1141_v34 }
  0x3a   :  { %357 = vmatpush.bf16.msrb.mxu2 %v1143_v35 }
  0x3b   :  { %370 = vmatpush.bf16.msrb.mxu3 %v1146_v39 }
  0x3c   :  { %332 = vmatpush.bf16.msrb.mxu0 %v1149_v45 }
  0x3d   :  { %345 = vmatpush.bf16.msrb.mxu1 %v1153_v46 }
  0x3e   :  { %358 = vmatpush.bf16.msrb.mxu2 %v1155_v47 }
  0x3f   :  { %371 = vmatpush.bf16.msrb.mxu3 %v1158_v51 }
  0x40   :  { %333 = vmatpush.bf16.msrb.mxu0 %v1161_v57 }
  0x41   :  { %346 = vmatpush.bf16.msrb.mxu1 %v1165_v58 }
  0x42   :  { %359 = vmatpush.bf16.msrb.mxu2 %v1167_v59 }
  0x43   :  { %372 = vmatpush.bf16.msrb.mxu3 %v1170_v63 }
  0x44   :  { %334 = vmatpush.bf16.msrb.mxu0 %v1173_v6 }
  0x45   :  { %347 = vmatpush.bf16.msrb.mxu1 %v1177_v10 }
  0x46   :  { %360 = vmatpush.bf16.msrb.mxu2 %v1179_v11 }
  0x47   :  { %373 = vmatpush.bf16.msrb.mxu3 %v1182_v16 }
  0x48   :  { %335 = vmatpush.bf16.msrb.mxu0 %v1185_v25 }
  0x49   :  { %348 = vmatpush.bf16.msrb.mxu1 %v1189_v27 }
  0x4a   :  { %361 = vmatpush.bf16.msrb.mxu2 %v1191_v28 }
  0x4b   :  { %374 = vmatpush.bf16.msrb.mxu3 %v1194_v33 }
  0x4c   :  { %336 = vmatpush.bf16.msrb.mxu0 %v1197_v42 }
  0x4d   :  { %349 = vmatpush.bf16.msrb.mxu1 %v1201_v43 }
  0x4e   :  { %362 = vmatpush.bf16.msrb.mxu2 %v1203_v44 }
  0x4f   :  { %375 = vmatpush.bf16.msrb.mxu3 %v1206_v48 }
  0x50   :  { %399 = vmatpush.bf16.msra.mxu0 %v1116_v4 }
  0x51   :  { %412 = vmatpush.bf16.msra.mxu1 %v1118_v8 }
  0x52   :  { %425 = vmatpush.bf16.msra.mxu2 %v1120_v9 }
  0x53   :  { %438 = vmatpush.bf16.msra.mxu3 %v1123_v13 }
  0x54   :  { %400 = vmatpush.bf16.msra.mxu0 %v1127_v17 }
  0x55   :  { %413 = vmatpush.bf16.msra.mxu1 %v1129_v18 }
  0x56   :  { %426 = vmatpush.bf16.msra.mxu2 %v1132_v22 }
  0x57   :  { %439 = vmatpush.bf16.msra.mxu3 %v1134_v26 }
  0x58   :  { %401 = vmatpush.bf16.msra.mxu0 %v1137_v30 }
  0x59   :  { %414 = vmatpush.bf16.msra.mxu1 %v1141_v34 }
  0x5a   :  { %427 = vmatpush.bf16.msra.mxu2 %v1143_v35 }
  0x5b   :  { %440 = vmatpush.bf16.msra.mxu3 %v1146_v39 }
  0x5c   :  { %402 = vmatpush.bf16.msra.mxu0 %v1149_v45 }
  0x5d   :  { %415 = vmatpush.bf16.msra.mxu1 %v1153_v46 }
  0x5e   :  { %428 = vmatpush.bf16.msra.mxu2 %v1155_v47 }
  0x5f   :  { %441 = vmatpush.bf16.msra.mxu3 %v1158_v51 }
  0x60   :  { %403 = vmatpush.bf16.msra.mxu0 %v1161_v57 }
  0x61   :  { %416 = vmatpush.bf16.msra.mxu1 %v1165_v58 }
  0x62   :  { %429 = vmatpush.bf16.msra.mxu2 %v1167_v59 }
  0x63   :  { %442 = vmatpush.bf16.msra.mxu3 %v1170_v63 }
  0x64   :  { %404 = vmatpush.bf16.msra.mxu0 %v1173_v6 }
  0x65   :  { %417 = vmatpush.bf16.msra.mxu1 %v1177_v10 }
  0x66   :  { %430 = vmatpush.bf16.msra.mxu2 %v1179_v11 }
  0x67   :  { %443 = vmatpush.bf16.msra.mxu3 %v1182_v16 }
  0x68   :  { %405 = vmatpush.bf16.msra.mxu0 %v1185_v25 }
  0x69   :  { %418 = vmatpush.bf16.msra.mxu1 %v1189_v27 }
  0x6a   :  { %431 = vmatpush.bf16.msra.mxu2 %v1191_v28 }
  0x6b   :  { %444 = vmatpush.bf16.msra.mxu3 %v1194_v33 }
  0x6c   :  { %406 = vmatpush.bf16.msra.mxu0 %v1197_v42 }
  0x6d   :  { %419 = vmatpush.bf16.msra.mxu1 %v1201_v43 }
  0x6e   :  { %432 = vmatpush.bf16.msra.mxu2 %v1203_v44 }
  0x6f   :  { %445 = vmatpush.bf16.msra.mxu3 %v1206_v48 }
  0xac   :  { %v267_v54 = vpop.f32.mrf.mxu0 }
  0xad   :  { %v280_v55 = vpop.f32.mrf.mxu1 }
  0xae   :  { %v281_v0 = vadd.f32 %v280_v55, %v267_v54 }
  0xb4   :  { %v293_v56 = vpop.f32.mrf.mxu2  ;;  %v269_v62 = vpop.f32.mrf.mxu0 }
  0xb5   :  { %v306_v61 = vpop.f32.mrf.mxu3  ;;  %v282_v2 = vpop.f32.mrf.mxu1 }
  0xb6   :  { %v307_v1 = vadd.f32 %v306_v61, %v293_v56 }
  0xb8   :  { %v312_v5 = vrot.slane %v307_v1, 6 }
  0xba   :  { %v314_v7 = vsel %vm313_vm0, %v281_v0, %v312_v5  ;;  %v389_v5 = vld [vmem:[#allocation4 + $0x4] sm:$0x3] }
  0xbb   :  { %v316_v12 = vadd.f32 %v314_v7, %v57_v3 }
  0xbc   :  { %v295_v14 = vpop.f32.mrf.mxu2 }
  0xbd   :  { %1010 = vtanh.f32 %v316_v12  ;;  %v308_v15 = vpop.f32.mrf.mxu3 }
  0xc3   :  { %v1011_v19 = vpop.eup %1010 }
  0xc4   :  { %322 = vst [vmem:[#allocation1] ss:$4 sm:$0xff] %v1011_v19 }
  0xcb   :  { %v323_v20 = vld.sshfl [vmem:[#allocation1] sm:$0xff pattern:$0x73625140]  ;;  %v324_v21 = vld.sshfl [vmem:[#allocation1 + $0x8] sm:$0xff pattern:$0x73625140] }
  0xcc   :  { %v327_v23 = vpack.c.bf16 %v323_v20, %v323_v20  ;;  %v328_v24 = vpack.c.bf16 %v324_v21, %v324_v21  ;;  %v390_v20 = vunpack.c.l.bf16 %v389_v5 }
  0xce   :  { %337 = vmatmul.bf16.vlgmr.msrb.gmra.mxu0 %v327_v23  ;;  %350 = vmatmul.bf16.vlgmr.msrb.gmra.mxu1 %v328_v24 }
  0xcf   :  { %363 = vmatmul.bf16.vlgmr.msrb.gmra.mxu2 %v327_v23  ;;  %376 = vmatmul.bf16.vlgmr.msrb.gmra.mxu3 %v328_v24 }
  0xd0   :  { %469 = vmatpush.bf16.msrb.mxu0 %v1116_v4  ;;  %482 = vmatpush.bf16.msrb.mxu1 %v1118_v8 }
  0xd1   :  { %495 = vmatpush.bf16.msrb.mxu2 %v1120_v9  ;;  %508 = vmatpush.bf16.msrb.mxu3 %v1123_v13 }
  0xd4   :  { %470 = vmatpush.bf16.msrb.mxu0 %v1127_v17  ;;  %483 = vmatpush.bf16.msrb.mxu1 %v1129_v18 }
  0xd5   :  { %496 = vmatpush.bf16.msrb.mxu2 %v1132_v22  ;;  %509 = vmatpush.bf16.msrb.mxu3 %v1134_v26 }
  0xd8   :  { %471 = vmatpush.bf16.msrb.mxu0 %v1137_v30  ;;  %484 = vmatpush.bf16.msrb.mxu1 %v1141_v34 }
  0xd9   :  { %497 = vmatpush.bf16.msrb.mxu2 %v1143_v35  ;;  %510 = vmatpush.bf16.msrb.mxu3 %v1146_v39 }
  0xdc   :  { %472 = vmatpush.bf16.msrb.mxu0 %v1149_v45  ;;  %485 = vmatpush.bf16.msrb.mxu1 %v1153_v46 }
  0xdd   :  { %498 = vmatpush.bf16.msrb.mxu2 %v1155_v47  ;;  %511 = vmatpush.bf16.msrb.mxu3 %v1158_v51 }
  0xe0   :  { %473 = vmatpush.bf16.msrb.mxu0 %v1161_v57  ;;  %486 = vmatpush.bf16.msrb.mxu1 %v1165_v58 }
  0xe1   :  { %499 = vmatpush.bf16.msrb.mxu2 %v1167_v59  ;;  %512 = vmatpush.bf16.msrb.mxu3 %v1170_v63 }
  0xe4   :  { %474 = vmatpush.bf16.msrb.mxu0 %v1173_v6  ;;  %487 = vmatpush.bf16.msrb.mxu1 %v1177_v10 }
  0xe5   :  { %500 = vmatpush.bf16.msrb.mxu2 %v1179_v11  ;;  %513 = vmatpush.bf16.msrb.mxu3 %v1182_v16 }
  0xe8   :  { %475 = vmatpush.bf16.msrb.mxu0 %v1185_v25  ;;  %488 = vmatpush.bf16.msrb.mxu1 %v1189_v27 }
  0xe9   :  { %501 = vmatpush.bf16.msrb.mxu2 %v1191_v28  ;;  %514 = vmatpush.bf16.msrb.mxu3 %v1194_v33 }
  0xec   :  { %476 = vmatpush.bf16.msrb.mxu0 %v1197_v42  ;;  %489 = vmatpush.bf16.msrb.mxu1 %v1201_v43 }
  0xed   :  { %502 = vmatpush.bf16.msrb.mxu2 %v1203_v44  ;;  %515 = vmatpush.bf16.msrb.mxu3 %v1206_v48 }
 0x14b   :  { %v338_v29 = vpop.f32.mrf.mxu0  ;;  %v351_v31 = vpop.f32.mrf.mxu1 }
 0x14c   :  { %v352_v50 = vadd.f32 %v351_v31, %v338_v29 }
 0x152   :  { %v364_v36 = vpop.f32.mrf.mxu2  ;;  %v377_v37 = vpop.f32.mrf.mxu3 }
 0x153   :  { %v378_v38 = vadd.f32 %v377_v37, %v364_v36  ;;  %v340_v40 = vpop.f32.mrf.mxu0  ;;  %v353_v41 = vpop.f32.mrf.mxu1 }
 0x155   :  { %v383_v52 = vrot.slane %v378_v38, 6 }
 0x157   :  { %v384_v53 = vsel %vm313_vm0, %v352_v50, %v383_v52  ;;  %v459_v52 = vld [vmem:[#allocation4 + $0x6] sm:$0x3] }
 0x158   :  { %v386_v54 = vadd.f32 %v384_v53, %v320_v49 }
 0x15a   :  { %1012 = vtanh.f32 %v386_v54  ;;  %v366_v55 = vpop.f32.mrf.mxu2  ;;  %v379_v56 = vpop.f32.mrf.mxu3 }
 0x160   :  { %v1013_v60 = vpop.eup %1012 }
 0x161   :  { %392 = vst [vmem:[#allocation1] ss:$4 sm:$0xff] %v1013_v60 }
 0x168   :  { %v393_v61 = vld.sshfl [vmem:[#allocation1] sm:$0xff pattern:$0x73625140]  ;;  %v394_v62 = vld.sshfl [vmem:[#allocation1 + $0x8] sm:$0xff pattern:$0x73625140] }
 0x169   :  { %v397_v0 = vpack.c.bf16 %v393_v61, %v393_v61  ;;  %v398_v1 = vpack.c.bf16 %v394_v62, %v394_v62  ;;  %v460_v61 = vunpack.c.l.bf16 %v459_v52 }
 0x16b   :  { %407 = vmatmul.bf16.vlgmr.msra.gmra.mxu0 %v397_v0  ;;  %420 = vmatmul.bf16.vlgmr.msra.gmra.mxu1 %v398_v1 }
 0x16c   :  { %433 = vmatmul.bf16.vlgmr.msra.gmra.mxu2 %v397_v0  ;;  %446 = vmatmul.bf16.vlgmr.msra.gmra.mxu3 %v398_v1 }
 0x16d   :  { %539 = vmatpush.bf16.msra.mxu0 %v1116_v4  ;;  %552 = vmatpush.bf16.msra.mxu1 %v1118_v8 }
 0x16e   :  { %565 = vmatpush.bf16.msra.mxu2 %v1120_v9  ;;  %578 = vmatpush.bf16.msra.mxu3 %v1123_v13 }
 0x171   :  { %540 = vmatpush.bf16.msra.mxu0 %v1127_v17  ;;  %553 = vmatpush.bf16.msra.mxu1 %v1129_v18 }
 0x172   :  { %566 = vmatpush.bf16.msra.mxu2 %v1132_v22  ;;  %579 = vmatpush.bf16.msra.mxu3 %v1134_v26 }
 0x175   :  { %541 = vmatpush.bf16.msra.mxu0 %v1137_v30  ;;  %554 = vmatpush.bf16.msra.mxu1 %v1141_v34 }
 0x176   :  { %567 = vmatpush.bf16.msra.mxu2 %v1143_v35  ;;  %580 = vmatpush.bf16.msra.mxu3 %v1146_v39 }
 0x179   :  { %542 = vmatpush.bf16.msra.mxu0 %v1149_v45  ;;  %555 = vmatpush.bf16.msra.mxu1 %v1153_v46 }
 0x17a   :  { %568 = vmatpush.bf16.msra.mxu2 %v1155_v47  ;;  %581 = vmatpush.bf16.msra.mxu3 %v1158_v51 }
 0x17d   :  { %543 = vmatpush.bf16.msra.mxu0 %v1161_v57  ;;  %556 = vmatpush.bf16.msra.mxu1 %v1165_v58 }
 0x17e   :  { %569 = vmatpush.bf16.msra.mxu2 %v1167_v59  ;;  %582 = vmatpush.bf16.msra.mxu3 %v1170_v63 }
 0x181   :  { %544 = vmatpush.bf16.msra.mxu0 %v1173_v6  ;;  %557 = vmatpush.bf16.msra.mxu1 %v1177_v10 }
 0x182   :  { %570 = vmatpush.bf16.msra.mxu2 %v1179_v11  ;;  %583 = vmatpush.bf16.msra.mxu3 %v1182_v16 }
 0x185   :  { %545 = vmatpush.bf16.msra.mxu0 %v1185_v25  ;;  %558 = vmatpush.bf16.msra.mxu1 %v1189_v27 }
 0x186   :  { %571 = vmatpush.bf16.msra.mxu2 %v1191_v28  ;;  %584 = vmatpush.bf16.msra.mxu3 %v1194_v33 }
 0x189   :  { %546 = vmatpush.bf16.msra.mxu0 %v1197_v42  ;;  %559 = vmatpush.bf16.msra.mxu1 %v1201_v43 }
 0x18a   :  { %572 = vmatpush.bf16.msra.mxu2 %v1203_v44  ;;  %585 = vmatpush.bf16.msra.mxu3 %v1206_v48 }
 0x1e8   :  { %v408_v2 = vpop.f32.mrf.mxu0  ;;  %v421_v3 = vpop.f32.mrf.mxu1 }
 0x1e9   :  { %v422_v21 = vadd.f32 %v421_v3, %v408_v2 }
 0x1ef   :  { %v434_v7 = vpop.f32.mrf.mxu2  ;;  %v447_v12 = vpop.f32.mrf.mxu3 }
 0x1f0   :  { %v448_v14 = vadd.f32 %v447_v12, %v434_v7  ;;  %v410_v15 = vpop.f32.mrf.mxu0  ;;  %v423_v19 = vpop.f32.mrf.mxu1 }
 0x1f2   :  { %v453_v23 = vrot.slane %v448_v14, 6 }
 0x1f4   :  { %v454_v24 = vsel %vm313_vm0, %v422_v21, %v453_v23  ;;  %v529_v23 = vld [vmem:[#allocation4 + $0x8] sm:$0x3] }
 0x1f5   :  { %v456_v29 = vadd.f32 %v454_v24, %v390_v20 }
 0x1f7   :  { %1014 = vtanh.f32 %v456_v29  ;;  %v436_v31 = vpop.f32.mrf.mxu2  ;;  %v449_v32 = vpop.f32.mrf.mxu3 }
 0x1fd   :  { %v1015_v36 = vpop.eup %1014 }
 0x1fe   :  { %462 = vst [vmem:[#allocation1] ss:$4 sm:$0xff] %v1015_v36 }
 0x205   :  { %v463_v37 = vld.sshfl [vmem:[#allocation1] sm:$0xff pattern:$0x73625140]  ;;  %v464_v38 = vld.sshfl [vmem:[#allocation1 + $0x8] sm:$0xff pattern:$0x73625140] }
 0x206   :  { %v467_v40 = vpack.c.bf16 %v463_v37, %v463_v37  ;;  %v468_v41 = vpack.c.bf16 %v464_v38, %v464_v38  ;;  %v530_v37 = vunpack.c.l.bf16 %v529_v23 }
 0x208   :  { %477 = vmatmul.bf16.vlgmr.msrb.gmra.mxu0 %v467_v40  ;;  %490 = vmatmul.bf16.vlgmr.msrb.gmra.mxu1 %v468_v41 }
 0x209   :  { %503 = vmatmul.bf16.vlgmr.msrb.gmra.mxu2 %v467_v40  ;;  %516 = vmatmul.bf16.vlgmr.msrb.gmra.mxu3 %v468_v41 }
 0x20a   :  { %609 = vmatpush.bf16.msrb.mxu0 %v1116_v4  ;;  %622 = vmatpush.bf16.msrb.mxu1 %v1118_v8 }
 0x20b   :  { %635 = vmatpush.bf16.msrb.mxu2 %v1120_v9  ;;  %648 = vmatpush.bf16.msrb.mxu3 %v1123_v13 }
 0x20e   :  { %610 = vmatpush.bf16.msrb.mxu0 %v1127_v17  ;;  %623 = vmatpush.bf16.msrb.mxu1 %v1129_v18 }
 0x20f   :  { %636 = vmatpush.bf16.msrb.mxu2 %v1132_v22  ;;  %649 = vmatpush.bf16.msrb.mxu3 %v1134_v26 }
 0x212   :  { %611 = vmatpush.bf16.msrb.mxu0 %v1137_v30  ;;  %624 = vmatpush.bf16.msrb.mxu1 %v1141_v34 }
 0x213   :  { %637 = vmatpush.bf16.msrb.mxu2 %v1143_v35  ;;  %650 = vmatpush.bf16.msrb.mxu3 %v1146_v39 }
 0x216   :  { %612 = vmatpush.bf16.msrb.mxu0 %v1149_v45  ;;  %625 = vmatpush.bf16.msrb.mxu1 %v1153_v46 }
 0x217   :  { %638 = vmatpush.bf16.msrb.mxu2 %v1155_v47  ;;  %651 = vmatpush.bf16.msrb.mxu3 %v1158_v51 }
 0x21a   :  { %613 = vmatpush.bf16.msrb.mxu0 %v1161_v57  ;;  %626 = vmatpush.bf16.msrb.mxu1 %v1165_v58 }
 0x21b   :  { %639 = vmatpush.bf16.msrb.mxu2 %v1167_v59  ;;  %652 = vmatpush.bf16.msrb.mxu3 %v1170_v63 }
 0x21e   :  { %614 = vmatpush.bf16.msrb.mxu0 %v1173_v6  ;;  %627 = vmatpush.bf16.msrb.mxu1 %v1177_v10 }
 0x21f   :  { %640 = vmatpush.bf16.msrb.mxu2 %v1179_v11  ;;  %653 = vmatpush.bf16.msrb.mxu3 %v1182_v16 }
 0x222   :  { %615 = vmatpush.bf16.msrb.mxu0 %v1185_v25  ;;  %628 = vmatpush.bf16.msrb.mxu1 %v1189_v27 }
 0x223   :  { %641 = vmatpush.bf16.msrb.mxu2 %v1191_v28  ;;  %654 = vmatpush.bf16.msrb.mxu3 %v1194_v33 }
 0x226   :  { %616 = vmatpush.bf16.msrb.mxu0 %v1197_v42  ;;  %629 = vmatpush.bf16.msrb.mxu1 %v1201_v43 }
 0x227   :  { %642 = vmatpush.bf16.msrb.mxu2 %v1203_v44  ;;  %655 = vmatpush.bf16.msrb.mxu3 %v1206_v48 }
 0x285   :  { %v478_v49 = vpop.f32.mrf.mxu0  ;;  %v491_v50 = vpop.f32.mrf.mxu1 }
 0x286   :  { %v492_v62 = vadd.f32 %v491_v50, %v478_v49 }
 0x28c   :  { %v504_v53 = vpop.f32.mrf.mxu2  ;;  %v517_v54 = vpop.f32.mrf.mxu3 }
 0x28d   :  { %v518_v55 = vadd.f32 %v517_v54, %v504_v53  ;;  %v480_v56 = vpop.f32.mrf.mxu0  ;;  %v493_v60 = vpop.f32.mrf.mxu1 }
 0x28f   :  { %v523_v0 = vrot.slane %v518_v55, 6 }
 0x291   :  { %v524_v1 = vsel %vm313_vm0, %v492_v62, %v523_v0 }
 0x292   :  { %v526_v2 = vadd.f32 %v524_v1, %v460_v61 }
 0x294   :  { %1016 = vtanh.f32 %v526_v2  ;;  %v506_v3 = vpop.f32.mrf.mxu2  ;;  %v519_v5 = vpop.f32.mrf.mxu3 }
 0x29a   :  { %v1017_v7 = vpop.eup %1016 }
 0x29b   :  { %532 = vst [vmem:[#allocation1] ss:$4 sm:$0xff] %v1017_v7 }
 0x2a2   :  { %v533_v12 = vld.sshfl [vmem:[#allocation1] sm:$0xff pattern:$0x73625140]  ;;  %v534_v14 = vld.sshfl [vmem:[#allocation1 + $0x8] sm:$0xff pattern:$0x73625140] }
 0x2a3   :  { %v537_v15 = vpack.c.bf16 %v533_v12, %v533_v12  ;;  %v538_v19 = vpack.c.bf16 %v534_v14, %v534_v14 }
 0x2a5   :  { %547 = vmatmul.bf16.vlgmr.msra.gmra.mxu0 %v537_v15  ;;  %560 = vmatmul.bf16.vlgmr.msra.gmra.mxu1 %v538_v19 }
 0x2a6   :  { %573 = vmatmul.bf16.vlgmr.msra.gmra.mxu2 %v537_v15  ;;  %586 = vmatmul.bf16.vlgmr.msra.gmra.mxu3 %v538_v19  ;;  %v739_v15 = vld [vmem:[#allocation4 + $0xe] sm:$0x3] }
 0x2a7   :  { %679 = vmatpush.bf16.msra.mxu0 %v1116_v4  ;;  %692 = vmatpush.bf16.msra.mxu1 %v1118_v8 }
 0x2a8   :  { %705 = vmatpush.bf16.msra.mxu2 %v1120_v9  ;;  %718 = vmatpush.bf16.msra.mxu3 %v1123_v13 }
 0x2ab   :  { %680 = vmatpush.bf16.msra.mxu0 %v1127_v17  ;;  %693 = vmatpush.bf16.msra.mxu1 %v1129_v18 }
 0x2ac   :  { %706 = vmatpush.bf16.msra.mxu2 %v1132_v22  ;;  %719 = vmatpush.bf16.msra.mxu3 %v1134_v26 }
 0x2af   :  { %681 = vmatpush.bf16.msra.mxu0 %v1137_v30  ;;  %694 = vmatpush.bf16.msra.mxu1 %v1141_v34 }
 0x2b0   :  { %707 = vmatpush.bf16.msra.mxu2 %v1143_v35  ;;  %720 = vmatpush.bf16.msra.mxu3 %v1146_v39 }
 0x2b3   :  { %682 = vmatpush.bf16.msra.mxu0 %v1149_v45  ;;  %695 = vmatpush.bf16.msra.mxu1 %v1153_v46 }
 0x2b4   :  { %708 = vmatpush.bf16.msra.mxu2 %v1155_v47  ;;  %721 = vmatpush.bf16.msra.mxu3 %v1158_v51 }
 0x2b7   :  { %683 = vmatpush.bf16.msra.mxu0 %v1161_v57  ;;  %696 = vmatpush.bf16.msra.mxu1 %v1165_v58 }
 0x2b8   :  { %709 = vmatpush.bf16.msra.mxu2 %v1167_v59  ;;  %722 = vmatpush.bf16.msra.mxu3 %v1170_v63 }
 0x2bb   :  { %684 = vmatpush.bf16.msra.mxu0 %v1173_v6  ;;  %697 = vmatpush.bf16.msra.mxu1 %v1177_v10 }
 0x2bc   :  { %710 = vmatpush.bf16.msra.mxu2 %v1179_v11  ;;  %723 = vmatpush.bf16.msra.mxu3 %v1182_v16 }
 0x2bf   :  { %685 = vmatpush.bf16.msra.mxu0 %v1185_v25  ;;  %698 = vmatpush.bf16.msra.mxu1 %v1189_v27 }
 0x2c0   :  { %711 = vmatpush.bf16.msra.mxu2 %v1191_v28  ;;  %724 = vmatpush.bf16.msra.mxu3 %v1194_v33 }
 0x2c3   :  { %686 = vmatpush.bf16.msra.mxu0 %v1197_v42  ;;  %699 = vmatpush.bf16.msra.mxu1 %v1201_v43 }
 0x2c4   :  { %712 = vmatpush.bf16.msra.mxu2 %v1203_v44  ;;  %725 = vmatpush.bf16.msra.mxu3 %v1206_v48 }
 0x322   :  { %v548_v20 = vpop.f32.mrf.mxu0  ;;  %v561_v21 = vpop.f32.mrf.mxu1 }
 0x323   :  { %v562_v38 = vadd.f32 %v561_v21, %v548_v20 }
 0x329   :  { %v574_v24 = vpop.f32.mrf.mxu2  ;;  %v587_v29 = vpop.f32.mrf.mxu3 }
 0x32a   :  { %v588_v31 = vadd.f32 %v587_v29, %v574_v24  ;;  %v550_v32 = vpop.f32.mrf.mxu0  ;;  %v563_v36 = vpop.f32.mrf.mxu1  ;;  %v740_v29 = vunpack.c.l.bf16 %v739_v15 }
 0x32c   :  { %v593_v40 = vrot.slane %v588_v31, 6 }
 0x32e   :  { %v594_v41 = vsel %vm313_vm0, %v562_v38, %v593_v40 }
 0x32f   :  { %v596_v49 = vadd.f32 %v594_v41, %v530_v37  ;;  %v813_v41 = vld [vmem:[%s1458_s2] sm:$0x3] }
 0x331   :  { %1018 = vtanh.f32 %v596_v49  ;;  %v576_v50 = vpop.f32.mrf.mxu2  ;;  %v589_v52 = vpop.f32.mrf.mxu3  ;;  %v816_v49 = vperm.slane %v813_v41, 1 }
 0x332   :  { %v815_v52 = vperm.slane %v813_v41, 0 }
 0x337   :  { %v1019_v53 = vpop.eup %1018 }
 0x338   :  { %602 = vst [vmem:[#allocation1] ss:$4 sm:$0xff] %v1019_v53  ;;  %v817_v53 = vrot.slane %v816_v49, 6 }
 0x33f   :  { %v603_v54 = vld.sshfl [vmem:[#allocation1] sm:$0xff pattern:$0x73625140]  ;;  %v604_v55 = vld.sshfl [vmem:[#allocation1 + $0x8] sm:$0xff pattern:$0x73625140] }
 0x340   :  { %v607_v56 = vpack.c.bf16 %v603_v54, %v603_v54  ;;  %v608_v60 = vpack.c.bf16 %v604_v55, %v604_v55  ;;  %v818_v54 = vsel %vm313_vm0, %v815_v52, %v817_v53 }
 0x342   :  { %617 = vmatmul.bf16.vlgmr.msrb.gmra.mxu0 %v607_v56  ;;  %630 = vmatmul.bf16.vlgmr.msrb.gmra.mxu1 %v608_v60 }
 0x343   :  { %643 = vmatmul.bf16.vlgmr.msrb.gmra.mxu2 %v607_v56  ;;  %656 = vmatmul.bf16.vlgmr.msrb.gmra.mxu3 %v608_v60 }
 0x344   :  { %749 = vmatpush.bf16.msrb.mxu0 %v1116_v4  ;;  %762 = vmatpush.bf16.msrb.mxu1 %v1118_v8 }
 0x345   :  { %775 = vmatpush.bf16.msrb.mxu2 %v1120_v9  ;;  %788 = vmatpush.bf16.msrb.mxu3 %v1123_v13  ;;  %v599_v9 = vld [vmem:[#allocation4 + $0xa] sm:$0x3] }
 0x348   :  { %750 = vmatpush.bf16.msrb.mxu0 %v1127_v17  ;;  %763 = vmatpush.bf16.msrb.mxu1 %v1129_v18 }
 0x349   :  { %776 = vmatpush.bf16.msrb.mxu2 %v1132_v22  ;;  %789 = vmatpush.bf16.msrb.mxu3 %v1134_v26 }
 0x34c   :  { %751 = vmatpush.bf16.msrb.mxu0 %v1137_v30  ;;  %764 = vmatpush.bf16.msrb.mxu1 %v1141_v34  ;;  %v600_v30 = vunpack.c.l.bf16 %v599_v9 }
 0x34d   :  { %777 = vmatpush.bf16.msrb.mxu2 %v1143_v35  ;;  %790 = vmatpush.bf16.msrb.mxu3 %v1146_v39 }
 0x350   :  { %752 = vmatpush.bf16.msrb.mxu0 %v1149_v45  ;;  %765 = vmatpush.bf16.msrb.mxu1 %v1153_v46 }
 0x351   :  { %778 = vmatpush.bf16.msrb.mxu2 %v1155_v47  ;;  %791 = vmatpush.bf16.msrb.mxu3 %v1158_v51 }
 0x354   :  { %753 = vmatpush.bf16.msrb.mxu0 %v1161_v57  ;;  %766 = vmatpush.bf16.msrb.mxu1 %v1165_v58 }
 0x355   :  { %779 = vmatpush.bf16.msrb.mxu2 %v1167_v59  ;;  %792 = vmatpush.bf16.msrb.mxu3 %v1170_v63 }
 0x358   :  { %754 = vmatpush.bf16.msrb.mxu0 %v1173_v6  ;;  %767 = vmatpush.bf16.msrb.mxu1 %v1177_v10 }
 0x359   :  { %780 = vmatpush.bf16.msrb.mxu2 %v1179_v11  ;;  %793 = vmatpush.bf16.msrb.mxu3 %v1182_v16  ;;  %v669_v11 = vld [vmem:[#allocation4 + $0xc] sm:$0x3] }
 0x35c   :  { %755 = vmatpush.bf16.msrb.mxu0 %v1185_v25  ;;  %768 = vmatpush.bf16.msrb.mxu1 %v1189_v27 }
 0x35d   :  { %781 = vmatpush.bf16.msrb.mxu2 %v1191_v28  ;;  %794 = vmatpush.bf16.msrb.mxu3 %v1194_v33 }
 0x360   :  { %756 = vmatpush.bf16.msrb.mxu0 %v1197_v42  ;;  %769 = vmatpush.bf16.msrb.mxu1 %v1201_v43  ;;  %v670_v42 = vunpack.c.l.bf16 %v669_v11 }
 0x361   :  { %782 = vmatpush.bf16.msrb.mxu2 %v1203_v44  ;;  %795 = vmatpush.bf16.msrb.mxu3 %v1206_v48 }
 0x3bf   :  { %v618_v4 = vpop.f32.mrf.mxu0  ;;  %v631_v8 = vpop.f32.mrf.mxu1 }
 0x3c0   :  { %v632_v34 = vadd.f32 %v631_v8, %v618_v4 }
 0x3c6   :  { %v644_v13 = vpop.f32.mrf.mxu2  ;;  %v657_v17 = vpop.f32.mrf.mxu3 }
 0x3c7   :  { %v658_v18 = vadd.f32 %v657_v17, %v644_v13  ;;  %v620_v22 = vpop.f32.mrf.mxu0  ;;  %v633_v26 = vpop.f32.mrf.mxu1  ;;  %v833_v17 = vstv %s1459_s3 }
 0x3c9   :  { %v663_v35 = vrot.slane %v658_v18, 6 }
 0x3cb   :  { %v664_v39 = vsel %vm313_vm0, %v632_v34, %v663_v35 }
 0x3cc   :  { %v666_v45 = vadd.f32 %v664_v39, %v600_v30 }
 0x3ce   :  { %1020 = vtanh.f32 %v666_v45  ;;  %v646_v46 = vpop.f32.mrf.mxu2  ;;  %v659_v47 = vpop.f32.mrf.mxu3 }
 0x3d4   :  { %v1021_v51 = vpop.eup %1020 }
 0x3d5   :  { %672 = vst [vmem:[#allocation1] ss:$4 sm:$0xff] %v1021_v51 }
 0x3dc   :  { %v673_v57 = vld.sshfl [vmem:[#allocation1] sm:$0xff pattern:$0x73625140]  ;;  %v674_v58 = vld.sshfl [vmem:[#allocation1 + $0x8] sm:$0xff pattern:$0x73625140] }
 0x3dd   :  { %v677_v59 = vpack.c.bf16 %v673_v57, %v673_v57  ;;  %v678_v63 = vpack.c.bf16 %v674_v58, %v674_v58 }
 0x3df   :  { %687 = vmatmul.bf16.vlgmr.msra.gmra.mxu0 %v677_v59  ;;  %700 = vmatmul.bf16.vlgmr.msra.gmra.mxu1 %v678_v63 }
 0x3e0   :  { %713 = vmatmul.bf16.vlgmr.msra.gmra.mxu2 %v677_v59  ;;  %726 = vmatmul.bf16.vlgmr.msra.gmra.mxu3 %v678_v63 }
 0x45c   :  { %v688_v6 = vpop.f32.mrf.mxu0  ;;  %v701_v10 = vpop.f32.mrf.mxu1 }
 0x45d   :  { %v702_v43 = vadd.f32 %v701_v10, %v688_v6 }
 0x463   :  { %v714_v16 = vpop.f32.mrf.mxu2  ;;  %v727_v25 = vpop.f32.mrf.mxu3 }
 0x464   :  { %v728_v27 = vadd.f32 %v727_v25, %v714_v16  ;;  %v690_v28 = vpop.f32.mrf.mxu0  ;;  %v703_v33 = vpop.f32.mrf.mxu1 }
 0x466   :  { %v733_v44 = vrot.slane %v728_v27, 6 }
 0x468   :  { %v734_v48 = vsel %vm313_vm0, %v702_v43, %v733_v44 }
 0x469   :  { %v736_v61 = vadd.f32 %v734_v48, %v670_v42 }
 0x46b   :  { %1022 = vtanh.f32 %v736_v61  ;;  %v716_v62 = vpop.f32.mrf.mxu2  ;;  %v729_v0 = vpop.f32.mrf.mxu3 }
 0x471   :  { %v1023_v1 = vpop.eup %1022 }
 0x472   :  { %742 = vst [vmem:[#allocation1] ss:$4 sm:$0xff] %v1023_v1 }
 0x479   :  { %v743_v2 = vld.sshfl [vmem:[#allocation1] sm:$0xff pattern:$0x73625140]  ;;  %v744_v3 = vld.sshfl [vmem:[#allocation1 + $0x8] sm:$0xff pattern:$0x73625140] }
 0x47a   :  { %v747_v5 = vpack.c.bf16 %v743_v2, %v743_v2  ;;  %v748_v7 = vpack.c.bf16 %v744_v3, %v744_v3 }
 0x47c   :  { %757 = vmatmul.bf16.vlgmr.msrb.gmra.mxu0 %v747_v5  ;;  %770 = vmatmul.bf16.vlgmr.msrb.gmra.mxu1 %v748_v7 }
 0x47d   :  { %783 = vmatmul.bf16.vlgmr.msrb.gmra.mxu2 %v747_v5  ;;  %796 = vmatmul.bf16.vlgmr.msrb.gmra.mxu3 %v748_v7 }
 0x4f9   :  { %v758_v12 = vpop.f32.mrf.mxu0  ;;  %v771_v14 = vpop.f32.mrf.mxu1 }
 0x4fa   :  { %v772_v31 = vadd.f32 %v771_v14, %v758_v12 }
 0x500   :  { %v784_v19 = vpop.f32.mrf.mxu2  ;;  %v797_v20 = vpop.f32.mrf.mxu3 }
 0x501   :  { %v798_v21 = vadd.f32 %v797_v20, %v784_v19  ;;  %v760_v23 = vpop.f32.mrf.mxu0  ;;  %v773_v24 = vpop.f32.mrf.mxu1 }
 0x503   :  { %v803_v32 = vrot.slane %v798_v21, 6 }
 0x505   :  { %v804_v36 = vsel %vm313_vm0, %v772_v31, %v803_v32 }
 0x506   :  { %v806_v37 = vadd.f32 %v804_v36, %v740_v29 }
 0x508   :  { %1024 = vtanh.f32 %v806_v37  ;;  %v786_v38 = vpop.f32.mrf.mxu2  ;;  %v799_v40 = vpop.f32.mrf.mxu3 }
 0x50e   :  { %v1025_v50 = vpop.eup %1024 }
 0x50f   :  { %808 = vst [vmem:[#allocation2] sm:$0xf] %v1025_v50 }
 0x516   :  { %v812_v55 = vld [vmem:[#allocation2] sm:$0xf] }
 0x517   :  { %v820_v56 = vmul.f32 %v818_v54, %v812_v55 }
 0x519   :  { %822 = vst [vmem:[#allocation1] ss:$4 sm:$0xff] %v820_v56 }
 0x520   :  { %v823_v60 = vld.sshfl [vmem:[#allocation1] sm:$0xff pattern:$0x73625140]  ;;  %v824_v4 = vld.sshfl [vmem:[#allocation1 + $0x8] sm:$0xff pattern:$0x73625140] }
 0x521   :  { %v827_v8 = vsel %vm313_vm0, %v823_v60, 0.0  ;;  %v828_v9 = vsel %vm313_vm0, %v824_v4, 0.0 }
 0x522   :  { %v829_v13 = vadd.f32 %v828_v9, %v827_v8 }
 0x524   :  { %830 = vadd.xlane.f32.xlu0 %v829_v13 }
 0x597   :  { %v831_v18 = vpop.xlane.xlu0 %830 }
 0x598   :  { %v834_v22 = vadd.f32 %v833_v17, %v831_v18 }
 0x59a   :  { %836 = vst.msk [vmem:[%s1460_s4] sm:$0x3] %vm835_vm1, %v834_v22 }
 0x59b   :  { %841 = vsyncpa [#allocation5], 1 }
 0x59c   :  { %842 = vsyncpa [#allocation7], 1 }

</bundles_post_ra>
